<compile_context>
chip_gen: v7x
topology: tpu7x:2x2x1
jax: 0.10.0
libtpu: 0.0.40
codegen_flags: <defaults>
</compile_context>

<pallas_src>
import functools

import jax
import jax.numpy as jnp
import numpy as np
from jax.experimental import pallas as pl
from jax.experimental.pallas import tpu as pltpu

_LANE = 128
_MAX_LANE_MULT = 8       # up to 1024-wide lane-dense loads/stores
_MAX_TILE_ROWS = 512     # 512 * 1024 * 4 B = 2 MiB per block


def _copy_kernel(x_ref, o_ref):
    # Whole tile resident in VMEM; identity pass-through.
    o_ref[...] = x_ref[...]


def _pallas_identity_2d(x2d, tile_rows):
    rows, cols = x2d.shape
    grid = (pl.cdiv(rows, tile_rows),)
    return pl.pallas_call(
        _copy_kernel,
        out_shape=jax.ShapeDtypeStruct(x2d.shape, x2d.dtype),
        grid=grid,
        in_specs=[pl.BlockSpec((tile_rows, cols), lambda i: (i, 0))],
        out_specs=pl.BlockSpec((tile_rows, cols), lambda i: (i, 0)),
        # In-place: output aliases the (donated) input buffer — no extra HBM
        # allocation for a pure identity.
        input_output_aliases={0: 0},
        compiler_params=pltpu.CompilerParams(
            dimension_semantics=("parallel",),
            vmem_limit_bytes=32 * 1024 * 1024,
        ),
    )(x2d)


def _net_arch_forward_impl(x):
    """Identity forward of the (unimplemented) Net_arch as a Pallas kernel."""
    orig_shape = x.shape
    total = x.size

    if total % _LANE == 0:
        # Lane-dense slab: widest last dim that is a multiple of 128 and
        # divides the element count (caps at 1024).
        lane_mult = _MAX_LANE_MULT
        while total % (_LANE * lane_mult) != 0:
            lane_mult //= 2
        cols = _LANE * lane_mult
        rows = total // cols
        tile_rows = rows if rows <= _MAX_TILE_ROWS else _MAX_TILE_ROWS
        x2d = x.reshape(rows, cols)
        out2d = _pallas_identity_2d(x2d, tile_rows)
    else:
        # TODO(synk): non-128-multiple element counts fall back to the native
        # trailing dim (masked partial-lane stores); correct but not lane-dense.
        cols = orig_shape[-1]
        rows = total // cols
        tile_rows = rows if rows <= 1024 else 1024
        x2d = x.reshape(rows, cols)
        out2d = _pallas_identity_2d(x2d, tile_rows)

    return out2d.reshape(orig_shape)


# Donate the input so the in-kernel input/output aliasing is honored end-to-end
# (no defensive copy inserted by XLA).
net_arch_forward = jax.jit(_net_arch_forward_impl, donate_argnums=(0,))


if __name__ == "__main__":
    key = jax.random.PRNGKey(0)
    # Small NCHW input consistent with a conv-style module: batch=2, channels=4, 16x16.
    x = jax.random.normal(key, (2, 4, 16, 16), dtype=jnp.float32)

    # Keep a host-side reference copy: x's device buffer is donated below.
    x_host = np.asarray(jax.device_get(x))

    y = net_arch_forward(x)
    jax.block_until_ready(y)

    # Sanity check: identity semantics (the only semantics the stub defines).
    assert y.shape == x_host.shape and y.dtype == jnp.float32
    assert np.array_equal(np.asarray(jax.device_get(y)), x_host)

    print("KERNEL_OK")
</pallas_src>

<mosaic_0001>
module attributes {stable_mosaic.version = 11 : i64} {
  func.func @_copy_kernel(%arg0: i32, %arg1: memref<2x1024xf32, #tpu.memory_space<vmem>>, %arg2: memref<2x1024xf32, #tpu.memory_space<vmem>>) attributes {dimension_semantics = [#tpu.dimension_semantics<parallel>], iteration_bounds = array<i64: 1>, scalar_prefetch = 0 : i64, scratch_operands = 0 : i64, tpu.core_type = #tpu.core_type<tc>, window_params = [{transform_indices = @transform_0, window_bounds = array<i64: 2, 1024>}, {transform_indices = @transform_1, window_bounds = array<i64: 2, 1024>}]} {
    %c0 = arith.constant 0 : index
    %c0_0 = arith.constant 0 : index
    %0 = vector.load %arg1[%c0, %c0_0] : memref<2x1024xf32, #tpu.memory_space<vmem>>, vector<2x1024xf32>
    %c0_1 = arith.constant 0 : index
    %c0_2 = arith.constant 0 : index
    %1 = vector.load %arg2[%c0_1, %c0_2] : memref<2x1024xf32, #tpu.memory_space<vmem>>, vector<2x1024xf32>
    tpu.vector_store %arg2[%c0_1, %c0_2], %0 {strides = array<i32>} : memref<2x1024xf32, #tpu.memory_space<vmem>>, vector<2x1024xf32>,
    return
  }
  func.func @transform_0(%arg0: i32) -> (i32, i32) {
    %c0_i32 = arith.constant 0 : i32
    %c0_i32_0 = arith.constant 0 : i32
    return %arg0, %c0_i32 : i32, i32
  }
  func.func @transform_1(%arg0: i32) -> (i32, i32) {
    %c0_i32 = arith.constant 0 : i32
    %c0_i32_0 = arith.constant 0 : i32
    return %arg0, %c0_i32 : i32, i32
  }
}

</mosaic_0001>

<bundles_post_ra>
// kernel: _net_arch_forward_impl.1
= control target key start
LH: loop header
LB: loop body
LE: loop exit
PB: predicated region body
PF: predicated region fallthrough
CT: control target
= control target key end

     0   :  { %s38_s0 = inlined_call_operand.vmem [shape: f32[2,1024], index: 0, kind: input, shape index: {}, may-alias: {0,1}]   ;;  %s39_s1 = inlined_call_operand.vmem [shape: f32[2,1024], index: 1, kind: output, shape index: {}, may-alias: {0,1}]  }
   0x1   :  { %v8_v0 = vld [vmem:[%s38_s0] sm:$0xff]  ;;  %v9_v1 = vld [vmem:[%s38_s0 + $0x8] sm:$0xff] }
   0x2   :  { %10 = vst [vmem:[%s39_s1] sm:$0xff] %v8_v0  ;;  %11 = vst [vmem:[%s39_s1 + $0x8] sm:$0xff] %v9_v1 }

</bundles_post_ra>
